<compile_context>
chip_gen: v7x
topology: tpu7x:2x2x1
jax: 0.10.0
libtpu: 0.0.40
codegen_flags: <defaults>
</compile_context>

<pallas_src>
import jax
import jax.numpy as jnp
from jax.experimental import pallas as pl
from jax.experimental.pallas import tpu as pltpu


def _round_up(x, m):
    return (x + m - 1) // m * m


def simplenet_kernel(x_ref, w1_ref, b1_ref, w2_ref, b2_ref, a_ref,
                     w3_ref, b3_ref, out_ref):
    # in-kernel bf16 cast (VPU pack) -- avoids a separate XLA cast pass over x
    x = x_ref[...].astype(jnp.bfloat16)                              # [TB, D_in]

    # fc1 + ReLU  (bf16 MXU operands, f32 accumulation / elementwise)
    h = jnp.dot(x, w1_ref[...], preferred_element_type=jnp.float32) + b1_ref[...]
    h = jnp.maximum(h, 0.0)

    # dropout(p=0.2): identity in inference/eval mode
    # TODO(synk): training-mode dropout (pltpu.prng_random_bits mask) not emitted here.

    # fc2 + PReLU (single shared alpha, scalar read from SMEM)
    h = jnp.dot(h.astype(jnp.bfloat16), w2_ref[...],
                preferred_element_type=jnp.float32) + b2_ref[...]
    alpha = a_ref[0, 0]
    h = jnp.where(h >= 0.0, h, alpha * h)

    # fc3 + sigmoid -- narrow (out_dim-wide) store, no lane padding / write amplification
    y = jnp.dot(h.astype(jnp.bfloat16), w3_ref[...],
                preferred_element_type=jnp.float32) + b3_ref[...]
    out_ref[...] = jax.nn.sigmoid(y)


def prepare_params(params):
    """One-time parameter prep hoisted out of the per-call forward path:
    cast the MXU weight operands to bf16; biases / PReLU alpha stay f32."""
    w1, b1, w2, b2, alpha, w3, b3 = params
    return (w1.astype(jnp.bfloat16), b1,
            w2.astype(jnp.bfloat16), b2,
            alpha,
            w3.astype(jnp.bfloat16), b3)


def simplenet_forward(x, prepared_params, *, block_b=4096):
    w1b, b1, w2b, b2, alpha, w3b, b3 = prepared_params
    B, d_in = x.shape
    hidden = w1b.shape[1]
    out_dim = w3b.shape[1]

    # Batch tile: multiple of 8 sublanes; for large B guarantee >=2 tiles so the
    # "parallel" batch axis can shard across v7x's 2 TensorCores. (Weights fit in
    # a few KiB of VMEM, so even tb=4096 keeps the working set ~1 MiB.)
    if B <= 8:
        tb = B                                      # block == full array dim (legal)
    else:
        tb = min(block_b, _round_up(pl.cdiv(B, 2), 8))

    # No wrapper-side batch padding: Pallas masks the partial last tile.
    grid = (pl.cdiv(B, tb),)
    vmem = pltpu.MemorySpace.VMEM

    out = pl.pallas_call(
        simplenet_kernel,
        out_shape=jax.ShapeDtypeStruct((B, out_dim), jnp.float32),
        grid=grid,
        in_specs=[
            pl.BlockSpec((tb, d_in), lambda i: (i, 0), memory_space=vmem),        # x tile (f32)
            pl.BlockSpec((d_in, hidden), lambda i: (0, 0), memory_space=vmem),    # w1 (resident)
            pl.BlockSpec((1, hidden), lambda i: (0, 0), memory_space=vmem),       # b1 (resident)
            pl.BlockSpec((hidden, hidden), lambda i: (0, 0), memory_space=vmem),  # w2 (resident)
            pl.BlockSpec((1, hidden), lambda i: (0, 0), memory_space=vmem),       # b2 (resident)
            pl.BlockSpec(memory_space=pltpu.MemorySpace.SMEM),                    # PReLU alpha
            pl.BlockSpec((hidden, out_dim), lambda i: (0, 0), memory_space=vmem), # w3 (resident)
            pl.BlockSpec((1, out_dim), lambda i: (0, 0), memory_space=vmem),      # b3 (resident)
        ],
        out_specs=pl.BlockSpec((tb, out_dim), lambda i: (i, 0), memory_space=vmem),
        compiler_params=pltpu.CompilerParams(
            dimension_semantics=("parallel",),      # batch tiles across TCs on v7x
        ),
    )(x, w1b, b1, w2b, b2, alpha, w3b, b3)

    return out


def init_params(key, input_dim, hidden_dim, output_dim):
    k1, k2, k3, k4, k5, k6 = jax.random.split(key, 6)
    scale1 = 1.0 / jnp.sqrt(input_dim)
    scale2 = 1.0 / jnp.sqrt(hidden_dim)
    # weights stored as [in, out] (transposed vs. PyTorch's [out, in])
    w1 = jax.random.uniform(k1, (input_dim, hidden_dim), jnp.float32, -scale1, scale1)
    b1 = jax.random.uniform(k2, (1, hidden_dim), jnp.float32, -scale1, scale1)
    w2 = jax.random.uniform(k3, (hidden_dim, hidden_dim), jnp.float32, -scale2, scale2)
    b2 = jax.random.uniform(k4, (1, hidden_dim), jnp.float32, -scale2, scale2)
    alpha = jnp.full((1, 1), 0.25, jnp.float32)        # nn.PReLU(1) default init
    w3 = jax.random.uniform(k5, (hidden_dim, output_dim), jnp.float32, -scale2, scale2)
    b3 = jax.random.uniform(k6, (1, output_dim), jnp.float32, -scale2, scale2)
    return (w1, b1, w2, b2, alpha, w3, b3)


if __name__ == "__main__":
    B, input_dim, hidden_dim, output_dim = 8, 16, 32, 1

    key = jax.random.PRNGKey(0)
    kx, kp = jax.random.split(key)
    x = jax.random.normal(kx, (B, input_dim), jnp.float32)
    params = init_params(kp, input_dim, hidden_dim, output_dim)
    prepared = prepare_params(params)      # one-time bf16 weight prep (not per call)

    out = simplenet_forward(x, prepared)
    out = jax.block_until_ready(out)

    # pure-JAX reference mirroring the kernel's bf16 MXU operands (f32 math)
    w1, b1, w2, b2, alpha, w3, b3 = params
    rnd = lambda a: a.astype(jnp.bfloat16).astype(jnp.float32)
    h = jnp.maximum(rnd(x) @ rnd(w1) + b1, 0.0)
    h = rnd(h) @ rnd(w2) + b2
    h = jnp.where(h >= 0.0, h, alpha[0, 0] * h)
    ref = jax.nn.sigmoid(rnd(h) @ rnd(w3) + b3)

    assert out.shape == (B, output_dim)
    assert jnp.allclose(out, ref, atol=1e-3, rtol=1e-3)

    print("KERNEL_OK")
</pallas_src>

<mosaic_0001>
module attributes {stable_mosaic.version = 11 : i64} {
  func.func @simplenet_kernel(%arg0: i32, %arg1: memref<8x16xf32, #tpu.memory_space<vmem>>, %arg2: memref<16x32xbf16, #tpu.memory_space<vmem>>, %arg3: memref<1x32xf32, #tpu.memory_space<vmem>>, %arg4: memref<32x32xbf16, #tpu.memory_space<vmem>>, %arg5: memref<1x32xf32, #tpu.memory_space<vmem>>, %arg6: memref<1x1xf32, #tpu.memory_space<smem>>, %arg7: memref<32x1xbf16, #tpu.memory_space<vmem>>, %arg8: memref<1x1xf32, #tpu.memory_space<vmem>>, %arg9: memref<8x1xf32, #tpu.memory_space<vmem>>) attributes {dimension_semantics = [#tpu.dimension_semantics<parallel>], iteration_bounds = array<i64: 1>, scalar_prefetch = 0 : i64, scratch_operands = 0 : i64, tpu.core_type = #tpu.core_type<tc>, window_params = [{transform_indices = @transform_0, window_bounds = array<i64: 8, 16>}, {pipeline_mode = #tpu.pipeline_mode<synchronous>, transform_indices = @transform_1, window_bounds = array<i64: 16, 32>}, {pipeline_mode = #tpu.pipeline_mode<synchronous>, transform_indices = @transform_2, window_bounds = array<i64: 1, 32>}, {pipeline_mode = #tpu.pipeline_mode<synchronous>, transform_indices = @transform_3, window_bounds = array<i64: 32, 32>}, {pipeline_mode = #tpu.pipeline_mode<synchronous>, transform_indices = @transform_4, window_bounds = array<i64: 1, 32>}, {transform_indices = @transform_5, window_bounds = array<i64: 1, 1>}, {pipeline_mode = #tpu.pipeline_mode<synchronous>, transform_indices = @transform_6, window_bounds = array<i64: 32, 1>}, {pipeline_mode = #tpu.pipeline_mode<synchronous>, transform_indices = @transform_7, window_bounds = array<i64: 1, 1>}, {transform_indices = @transform_8, window_bounds = array<i64: 8, 1>}]} {
    %c0 = arith.constant 0 : index
    %c0_0 = arith.constant 0 : index
    %0 = vector.load %arg1[%c0, %c0_0] : memref<8x16xf32, #tpu.memory_space<vmem>>, vector<8x16xf32>
    %1 = arith.truncf %0 : vector<8x16xf32> to vector<8x16xbf16>
    %c0_1 = arith.constant 0 : index
    %c0_2 = arith.constant 0 : index
    %2 = vector.load %arg2[%c0_1, %c0_2] : memref<16x32xbf16, #tpu.memory_space<vmem>>, vector<16x32xbf16>
    %cst = arith.constant dense<0.000000e+00> : vector<8x32xf32>
    %3 = tpu.matmul %1, %2, %cst {dimension_numbers = #tpu.dot_dimension_numbers<[1], [0], [0], [1], [0, 0, 1, 1], [], []>} : vector<8x16xbf16>, vector<16x32xbf16>, vector<8x32xf32> -> vector<8x32xf32>
    %c0_3 = arith.constant 0 : index
    %c0_4 = arith.constant 0 : index
    %4 = vector.load %arg3[%c0_3, %c0_4] : memref<1x32xf32, #tpu.memory_space<vmem>>, vector<1x32xf32>
    %5 = vector.broadcast %4 : vector<1x32xf32> to vector<8x32xf32>
    %6 = arith.addf %3, %5 : vector<8x32xf32>
    %cst_5 = arith.constant 0.000000e+00 : f32
    %7 = vector.broadcast %cst_5 : f32 to vector<8x32xf32>
    %8 = arith.maximumf %6, %7 : vector<8x32xf32>
    %9 = arith.truncf %8 : vector<8x32xf32> to vector<8x32xbf16>
    %c0_6 = arith.constant 0 : index
    %c0_7 = arith.constant 0 : index
    %10 = vector.load %arg4[%c0_6, %c0_7] : memref<32x32xbf16, #tpu.memory_space<vmem>>, vector<32x32xbf16>
    %cst_8 = arith.constant dense<0.000000e+00> : vector<8x32xf32>
    %11 = tpu.matmul %9, %10, %cst_8 {dimension_numbers = #tpu.dot_dimension_numbers<[1], [0], [0], [1], [0, 0, 1, 1], [], []>} : vector<8x32xbf16>, vector<32x32xbf16>, vector<8x32xf32> -> vector<8x32xf32>
    %c0_9 = arith.constant 0 : index
    %c0_10 = arith.constant 0 : index
    %12 = vector.load %arg5[%c0_9, %c0_10] : memref<1x32xf32, #tpu.memory_space<vmem>>, vector<1x32xf32>
    %13 = vector.broadcast %12 : vector<1x32xf32> to vector<8x32xf32>
    %14 = arith.addf %11, %13 : vector<8x32xf32>
    %c0_11 = arith.constant 0 : index
    %c0_12 = arith.constant 0 : index
    %15 = memref.load %arg6[%c0_11, %c0_12] : memref<1x1xf32, #tpu.memory_space<smem>>
    %cst_13 = arith.constant 0.000000e+00 : f32
    %16 = vector.broadcast %cst_13 : f32 to vector<8x32xf32>
    %17 = arith.cmpf oge, %14, %16 : vector<8x32xf32>
    %18 = vector.broadcast %15 : f32 to vector<8x32xf32>
    %19 = arith.mulf %18, %14 : vector<8x32xf32>
    %20 = arith.select %17, %14, %19 : vector<8x32xi1>, vector<8x32xf32>
    %21 = arith.truncf %20 : vector<8x32xf32> to vector<8x32xbf16>
    %c0_14 = arith.constant 0 : index
    %c0_15 = arith.constant 0 : index
    %22 = vector.load %arg7[%c0_14, %c0_15] : memref<32x1xbf16, #tpu.memory_space<vmem>>, vector<32x1xbf16>
    %cst_16 = arith.constant dense<0.000000e+00> : vector<8x1xf32>
    %23 = tpu.matmul %21, %22, %cst_16 {dimension_numbers = #tpu.dot_dimension_numbers<[1], [0], [0], [1], [0, 0, 1, 1], [], []>} : vector<8x32xbf16>, vector<32x1xbf16>, vector<8x1xf32> -> vector<8x1xf32>
    %c0_17 = arith.constant 0 : index
    %c0_18 = arith.constant 0 : index
    %24 = vector.load %arg8[%c0_17, %c0_18] : memref<1x1xf32, #tpu.memory_space<vmem>>, vector<1x1xf32>
    %25 = vector.broadcast %24 : vector<1x1xf32> to vector<8x1xf32>
    %26 = arith.addf %23, %25 : vector<8x1xf32>
    %27 = arith.negf %26 : vector<8x1xf32>
    %28 = math.exp %27 : vector<8x1xf32>
    %cst_19 = arith.constant 1.000000e+00 : f32
    %29 = vector.broadcast %cst_19 : f32 to vector<8x1xf32>
    %30 = arith.addf %29, %28 : vector<8x1xf32>
    %31 = arith.divf %29, %30 : vector<8x1xf32>
    %c0_20 = arith.constant 0 : index
    %c0_21 = arith.constant 0 : index
    %32 = vector.load %arg9[%c0_20, %c0_21] : memref<8x1xf32, #tpu.memory_space<vmem>>, vector<8x1xf32>
    tpu.vector_store %arg9[%c0_20, %c0_21], %31 {strides = array<i32>} : memref<8x1xf32, #tpu.memory_space<vmem>>, vector<8x1xf32>,
    return
  }
  func.func @transform_0(%arg0: i32) -> (i32, i32) {
    %c0_i32 = arith.constant 0 : i32
    %c0_i32_0 = arith.constant 0 : i32
    return %arg0, %c0_i32 : i32, i32
  }
  func.func @transform_1(%arg0: i32) -> (i32, i32) {
    %c0_i32 = arith.constant 0 : i32
    %c0_i32_0 = arith.constant 0 : i32
    %c0_i32_1 = arith.constant 0 : i32
    return %c0_i32, %c0_i32_0 : i32, i32
  }
  func.func @transform_2(%arg0: i32) -> (i32, i32) {
    %c0_i32 = arith.constant 0 : i32
    %c0_i32_0 = arith.constant 0 : i32
    %c0_i32_1 = arith.constant 0 : i32
    return %c0_i32, %c0_i32_0 : i32, i32
  }
  func.func @transform_3(%arg0: i32) -> (i32, i32) {
    %c0_i32 = arith.constant 0 : i32
    %c0_i32_0 = arith.constant 0 : i32
    %c0_i32_1 = arith.constant 0 : i32
    return %c0_i32, %c0_i32_0 : i32, i32
  }
  func.func @transform_4(%arg0: i32) -> (i32, i32) {
    %c0_i32 = arith.constant 0 : i32
    %c0_i32_0 = arith.constant 0 : i32
    %c0_i32_1 = arith.constant 0 : i32
    return %c0_i32, %c0_i32_0 : i32, i32
  }
  func.func @transform_5(%arg0: i32) -> (i32, i32) {
    %c0_i32 = arith.constant 0 : i32
    %c0_i32_0 = arith.constant 0 : i32
    %c0_i32_1 = arith.constant 0 : i32
    return %c0_i32, %c0_i32_0 : i32, i32
  }
  func.func @transform_6(%arg0: i32) -> (i32, i32) {
    %c0_i32 = arith.constant 0 : i32
    %c0_i32_0 = arith.constant 0 : i32
    %c0_i32_1 = arith.constant 0 : i32
    return %c0_i32, %c0_i32_0 : i32, i32
  }
  func.func @transform_7(%arg0: i32) -> (i32, i32) {
    %c0_i32 = arith.constant 0 : i32
    %c0_i32_0 = arith.constant 0 : i32
    %c0_i32_1 = arith.constant 0 : i32
    return %c0_i32, %c0_i32_0 : i32, i32
  }
  func.func @transform_8(%arg0: i32) -> (i32, i32) {
    %c0_i32 = arith.constant 0 : i32
    %c0_i32_0 = arith.constant 0 : i32
    return %arg0, %c0_i32 : i32, i32
  }
}

</mosaic_0001>

<bundles_post_ra>
// kernel: tpu_custom_call.1
= control target key start
LH: loop header
LB: loop body
LE: loop exit
PB: predicated region body
PF: predicated region fallthrough
CT: control target
= control target key end

     0   :  { %s430_s0 = inlined_call_operand.vmem [shape: f32[8,16], index: 0, kind: input, shape index: {}]   ;;  %s431_s1 = inlined_call_operand.vmem [shape: bf16[16,32], index: 1, kind: input, shape index: {}]   ;;  %s432_s2 = inlined_call_operand.hbm [shape: f32[1,32], index: 2, kind: input, shape index: {}]   ;;  %s433_s3 = inlined_call_operand.vmem [shape: bf16[32,32], index: 3, kind: input, shape index: {}]   ;;  %s434_s4 = inlined_call_operand.vmem [shape: f32[1,32], index: 4, kind: input, shape index: {}]   ;;  %s435_s5 = inlined_call_operand.<no memory space> [shape: f32[1,1], index: 5, kind: input, shape index: {}]   ;;  %s436_s6 = inlined_call_operand.vmem [shape: bf16[32,1], index: 6, kind: input, shape index: {}]   ;;  %s437_s7 = inlined_call_operand.<no memory space> [shape: f32[1,1], index: 7, kind: input, shape index: {}]   ;;  %s438_s8 = inlined_call_operand.vmem [shape: f32[8,1], index: 8, kind: output, shape index: {}]  }
   0x1   :  { %v14_v0 = vstv %s437_s7 }
   0x2   :  { %15 = vst [vmem:[#allocation3] sm:$0x1] %v14_v0 }
   0x3   :  { %16 = vsyncpa [#allocation5], 0  ;;  %s338_s29 = smov [#allocation4]   ;;  %s314_s11 = scalar_lea.hbm %s432_s2, 16 }
   0x4   :  { %s27_s30 = sshll.u32 %s338_s29, 4  ;;  %p315_p0 = scmp.ne.s32.totalorder %s432_s2, %s314_s11  ;;  %s28_s30 = int_to_ptr.vmem [resolvable:$true] %s27_s30 }
   0x5   :  { %p318_p1 = scmp.lt.u32.totalorder %s314_s11, %s432_s2 }
   0x7   :  { %p320_p2 = pnand %p318_p1, %p315_p0 }
   0x9   :  { %323 = shalt.err (!%p320_p2)
}
   0xa   :  { %s324_s7 = scalar_lea.vmem %s28_s30, 16  ;;  %s328_s16 = scalar_lea.vmem %s28_s30, 32 }
   0xb   :  { %p325_p3 = scmp.ne.s32.totalorder %s28_s30, %s324_s7  ;;  %p329_p4 = scmp.lt.s32.totalorder %s28_s30, %s28_s30 }
   0xc   :  { %p330_p5 = scmp.lt.s32.totalorder %s328_s16, %s324_s7 }
   0xe   :  { %p331_p6 = por %p330_p5, %p329_p4 }
  0x10   :  { %p332_p7 = pnand %p331_p6, %p325_p3 }
  0x12   :  { %335 = shalt.err (!%p332_p7)
}
  0x13   :  { %30 = dma.hbm_to_vmem [thread:$0]  %s432_s2, 16, %s28_s30, [#allocation5]  }
  0x14   :  { %336 = dma.done.wait [#allocation5], 16  }
  0x15   :  { %337 = vsyncadd [#allocation5], 4294967280  ;;  %v339_v1 = vmov 0.0   ;;  %vm340_vm0 = vmmov 0   ;;  %v305_v2 = vld [vmem:[%s431_s1] sm:$0xff]   ;;  %vm62_vm1 = vcmask 130048   ;;  %v177_v19 = vstv %s435_s5 }
  0x16   :  { %280 = vmatprep.subr.bf16.mxu0 %v339_v1  ;;  %282 = vmatprep.mubr.msk.bf16.mxu0 %vm340_vm0, %v339_v1  ;;  %v45_v3 = vld [vmem:[%s430_s0] sm:$0xff]  ;;  %v307_v6 = vld [vmem:[%s433_s3 + $0x8] sm:$0xff]   ;;  %vm131_vm2 = vcmask 261120   ;;  %vm253_vm4 = vcmask 7168  }
  0x17   :  { %286 = vmatprep.subr.bf16.mxu1 %v339_v1  ;;  %290 = vmatprep.mubr.msk.bf16.mxu1 %vm340_vm0, %v339_v1  ;;  %v46_v4 = vpack.c.bf16 %v45_v3, %v45_v3  ;;  %v306_v5 = vld [vmem:[%s433_s3] sm:$0xff]   ;;  %v309_v16 = vld [vmem:[%s436_s6 + $0x8] sm:$0xff]  }
  0x18   :  { %281 = vmatpush3.bf16.msra.mxu0 %v305_v2  ;;  %287 = vmatpush3.bf16.msra.mxu1 %v306_v5  ;;  %v260_v7 = vld [vmem:[#allocation4] ss:$0 sm:$0xff]  ;;  %v263_v17 = vld [vmem:[%s434_s4] ss:$0 sm:$0xff] }
  0x19   :  { %294 = vmatprep.subr.bf16.mxu0 %v339_v1  ;;  %288 = vmatprep.subr.bf16.mxu1 %v339_v1  ;;  %v308_v15 = vld [vmem:[%s436_s6] sm:$0xff]  }
  0x1a   :  { %v267_v27 = vld [vmem:[#allocation3] ss:$0 sm:$0xff] }
  0x1b   :  { %283 = vmatmul.mubr.msk.bf16.vlgmr.msra.gmra.mrb[0].mxu0 %vm62_vm1, %v46_v4 }
  0x1c   :  { %298 = vmatprep.mubr.msk.bf16.mxu0 %vm340_vm0, %v339_v1  ;;  %289 = vmatpush3.bf16.msra.mxu1 %v307_v6 }
  0x1d   :  { %295 = vmatpush3.bf16.msra.mxu0 %v308_v15 }
  0x1e   :  { %296 = vmatprep.subr.bf16.mxu0 %v339_v1 }
  0x21   :  { %297 = vmatpush3.bf16.msra.mxu0 %v309_v16 }
  0xee   :  { %v100_v8 = vpop.f32.mrb[0].mxu0 }
  0xef   :  { %v101_v9 = vadd.f32 %v260_v7, %v100_v8  ;;  %v284_v10 = vpop.f32.mrb[1].mxu0 }
  0xf0   :  { %v103_v11 = vpop.f32.mrb[2].mxu0 }
  0xf1   :  { %v106_v12 = vmax.f32 %v101_v9, 0.0  ;;  %v285_v13 = vpop.f32.mrb[3].mxu0 }
  0xf3   :  { %v107_v14 = vpack.c.bf16 %v106_v12, %v106_v12 }
  0xf5   :  { %291 = vmatmul.mubr.msk.bf16.vlgmr.msra.gmra.mrb[0].mxu1 %vm131_vm2, %v107_v14 }
 0x1c8   :  { %v169_v18 = vpop.f32.mrb[0].mxu1 }
 0x1c9   :  { %v170_v20 = vadd.f32 %v263_v17, %v169_v18  ;;  %v292_v21 = vpop.f32.mrb[1].mxu1 }
 0x1ca   :  { %v172_v22 = vpop.f32.mrb[2].mxu1 }
 0x1cb   :  { %vm176_vm3 = vcmp.ge.f32.partialorder %v170_v20, 0.0  ;;  %v178_v23 = vmul.f32 %v177_v19, %v170_v20  ;;  %v293_v24 = vpop.f32.mrb[3].mxu1 }
 0x1cd   :  { %v179_v25 = vsel %vm176_vm3, %v170_v20, %v178_v23 }
 0x1ce   :  { %v180_v26 = vpack.c.bf16 %v179_v25, %v179_v25 }
 0x1d0   :  { %299 = vmatmul.mubr.msk.bf16.vlgmr.msra.gmra.mrb[4].mxu0 %vm131_vm2, %v180_v26 }
 0x2a3   :  { %v241_v28 = vpop.f32.mrb[4].mxu0 }
 0x2a4   :  { %v242_v29 = vadd.f32 %v267_v27, %v241_v28  ;;  %v300_v30 = vpop.f32.mrb[5].mxu0 }
 0x2a5   :  { %v244_v31 = vpop.f32.mrb[6].mxu0 }
 0x2a6   :  { %v271_v32 = vmul.f32 -1.442695, %v242_v29  ;;  %v301_v33 = vpop.f32.mrb[7].mxu0 }
 0x2a8   :  { %310 = vpow2.f32 %v271_v32 }
 0x2b2   :  { %v311_v34 = vpop.eup %310 }
 0x2b3   :  { %v250_v35 = vadd.f32 1.0, %v311_v34 }
 0x2b5   :  { %312 = vrcp.f32 %v250_v35 }
 0x2bf   :  { %v313_v36 = vpop.eup %312 }
 0x2c0   :  { %254 = vst.msk [vmem:[%s438_s8] sm:$0xff] %vm253_vm4, %v313_v36 }
 0x2c1   :  { %259 = vsyncpa [#allocation5], 1 }

</bundles_post_ra>
